<compile_context>
chip_gen: v7x
topology: tpu7x:2x2x1
jax: 0.10.0
libtpu: 0.0.40
codegen_flags: <defaults>
</compile_context>

<pallas_src>
import functools

import jax
import jax.numpy as jnp
from jax.experimental import pallas as pl
from jax.experimental.pallas import tpu as pltpu


def _round_up(x: int, m: int) -> int:
    return ((x + m - 1) // m) * m


def fcnn_kernel(x_ref, w1t_ref, b1_ref, w2t_ref, b2_ref, o_ref):
    # x:   [TB, D_in]   (f32, cast to bf16 in-kernel)
    # w1t: [D_in, H_p]  (bf16),  b1: [1, H_p]   (f32)
    # w2t: [H_p, D_out] (bf16),  b2: [1, D_out] (f32)
    # o:   [TB, D_out]  (f32)
    x = x_ref[...].astype(jnp.bfloat16)
    h = jnp.dot(x, w1t_ref[...], preferred_element_type=jnp.float32)
    h = jnp.maximum(h + b1_ref[...], 0.0)           # bias + ReLU in f32
    # Dropout (eval mode) == identity.
    h = h.astype(w2t_ref.dtype)                     # bf16 for second MXU matmul
    out = jnp.dot(h, w2t_ref[...], preferred_element_type=jnp.float32)
    o_ref[...] = (out + b2_ref[...]).astype(o_ref.dtype)


def prepare_fcnn_params(w1, b1, w2, b2):
    """One-time param prep: transpose to [in, out], pad H to 128, cast to bf16.

    w1: [H, D_in]  b1: [H]  w2: [D_out, H]  b2: [D_out]  (PyTorch Linear layout)
    D_in and D_out are NOT padded (kept at their true sizes in HBM).
    """
    hidden, d_in = w1.shape
    d_out = w2.shape[0]
    h_p = _round_up(hidden, 128)

    w1t = jnp.zeros((d_in, h_p), jnp.bfloat16).at[:, :hidden].set(
        jnp.asarray(w1, jnp.float32).T.astype(jnp.bfloat16))
    w2t = jnp.zeros((h_p, d_out), jnp.bfloat16).at[:hidden, :].set(
        jnp.asarray(w2, jnp.float32).T.astype(jnp.bfloat16))
    b1p = jnp.zeros((1, h_p), jnp.float32).at[0, :hidden].set(
        jnp.asarray(b1, jnp.float32))
    b2p = jnp.asarray(b2, jnp.float32).reshape(1, d_out)

    return dict(w1t=w1t, b1=b1p, w2t=w2t, b2=b2p)


@functools.partial(jax.jit, static_argnames=("max_tb",))
def fcnn_forward(x, params, *, max_tb=4096):
    """x: [B, D_in] float. Returns [B, D_out] f32."""
    w1t, b1, w2t, b2 = params["w1t"], params["b1"], params["w2t"], params["b2"]
    B, d_in = x.shape
    assert d_in == w1t.shape[0], "input feature size mismatch"
    h_p = w1t.shape[1]
    d_out = w2t.shape[1]

    # --- static tile / grid selection (bounded padding, >=2 even steps if possible)
    b8 = _round_up(B, 8)
    if b8 >= 16:
        n_steps = max(2, -(-b8 // max_tb))
        if n_steps % 2:
            n_steps += 1                      # even grid for TC load balance
    else:
        n_steps = 1
    tb = _round_up(-(-b8 // n_steps), 8)
    b_pad = tb * n_steps

    x_in = x.astype(jnp.float32)
    if b_pad != B:
        x_in = jnp.pad(x_in, ((0, b_pad - B), (0, 0)))

    bytes_accessed = (b_pad * d_in * 4 + w1t.size * 2 + w2t.size * 2 +
                      b1.size * 4 + b2.size * 4 + b_pad * d_out * 4)
    cost = pl.CostEstimate(
        flops=2 * b_pad * (d_in * h_p + h_p * d_out),
        transcendentals=0,
        bytes_accessed=bytes_accessed)

    out = pl.pallas_call(
        fcnn_kernel,
        out_shape=jax.ShapeDtypeStruct((b_pad, d_out), jnp.float32),
        grid_spec=pltpu.PrefetchScalarGridSpec(
            num_scalar_prefetch=0,
            grid=(n_steps,),
            in_specs=[
                pl.BlockSpec((tb, d_in), lambda i: (i, 0)),    # x tile (full D_in)
                pl.BlockSpec((d_in, h_p), lambda i: (0, 0)),   # W1t resident
                pl.BlockSpec((1, h_p), lambda i: (0, 0)),      # b1 resident
                pl.BlockSpec((h_p, d_out), lambda i: (0, 0)),  # W2t resident
                pl.BlockSpec((1, d_out), lambda i: (0, 0)),    # b2 resident
            ],
            out_specs=pl.BlockSpec((tb, d_out), lambda i: (i, 0)),
        ),
        compiler_params=pltpu.CompilerParams(
            dimension_semantics=("parallel",)),
        cost_estimate=cost,
    )(x_in, w1t, b1, w2t, b2)

    if b_pad != B:
        out = out[:B]
    return out


def reference_forward(x, w1, b1, w2, b2):
    h = jnp.maximum(x @ w1.T + b1, 0.0)
    return h @ w2.T + b2


if __name__ == "__main__":
    # Small shapes consistent with the module's forward.
    batch, input_size, hidden_size, output_size = 8, 32, 64, 16
    dropout_rate = 0.5  # unused at inference (identity)

    key = jax.random.PRNGKey(0)
    k1, k2, k3, k4, k5 = jax.random.split(key, 5)

    # Deterministic "PyTorch-style" init: U(-1/sqrt(fan_in), 1/sqrt(fan_in)).
    bound1 = 1.0 / jnp.sqrt(jnp.float32(input_size))
    bound2 = 1.0 / jnp.sqrt(jnp.float32(hidden_size))
    w1 = jax.random.uniform(k1, (hidden_size, input_size), jnp.float32, -bound1, bound1)
    b1 = jax.random.uniform(k2, (hidden_size,), jnp.float32, -bound1, bound1)
    w2 = jax.random.uniform(k3, (output_size, hidden_size), jnp.float32, -bound2, bound2)
    b2 = jax.random.uniform(k4, (output_size,), jnp.float32, -bound2, bound2)

    x = jax.random.normal(k5, (batch, input_size), jnp.float32)

    # One-time parameter prep (transpose + pad H + bf16 cast), then forward.
    params = prepare_fcnn_params(w1, b1, w2, b2)
    out = fcnn_forward(x, params)
    out = jax.block_until_ready(out)

    ref = reference_forward(x, w1, b1, w2, b2)
    assert out.shape == (batch, output_size)
    # bf16 matmul inputs with f32 accumulation -> compare at bf16-level tolerance.
    assert jnp.allclose(out, ref, atol=2e-2, rtol=2e-2), "mismatch vs reference"

    print("KERNEL_OK")
</pallas_src>

<mosaic_0001>
module attributes {stable_mosaic.version = 11 : i64} {
  func.func @fcnn_kernel(%arg0: i32, %arg1: memref<8x32xf32, #tpu.memory_space<vmem>>, %arg2: memref<32x128xbf16, #tpu.memory_space<vmem>>, %arg3: memref<1x128xf32, #tpu.memory_space<vmem>>, %arg4: memref<128x16xbf16, #tpu.memory_space<vmem>>, %arg5: memref<1x16xf32, #tpu.memory_space<vmem>>, %arg6: memref<8x16xf32, #tpu.memory_space<vmem>>) attributes {dimension_semantics = [#tpu.dimension_semantics<parallel>], iteration_bounds = array<i64: 1>, scalar_prefetch = 0 : i64, scratch_operands = 0 : i64, tpu.core_type = #tpu.core_type<tc>, window_params = [{transform_indices = @transform_0, window_bounds = array<i64: 8, 32>}, {pipeline_mode = #tpu.pipeline_mode<synchronous>, transform_indices = @transform_1, window_bounds = array<i64: 32, 128>}, {pipeline_mode = #tpu.pipeline_mode<synchronous>, transform_indices = @transform_2, window_bounds = array<i64: 1, 128>}, {pipeline_mode = #tpu.pipeline_mode<synchronous>, transform_indices = @transform_3, window_bounds = array<i64: 128, 16>}, {pipeline_mode = #tpu.pipeline_mode<synchronous>, transform_indices = @transform_4, window_bounds = array<i64: 1, 16>}, {transform_indices = @transform_5, window_bounds = array<i64: 8, 16>}]} {
    %c0 = arith.constant 0 : index
    %c0_0 = arith.constant 0 : index
    %0 = vector.load %arg1[%c0, %c0_0] : memref<8x32xf32, #tpu.memory_space<vmem>>, vector<8x32xf32>
    %1 = arith.truncf %0 : vector<8x32xf32> to vector<8x32xbf16>
    %c0_1 = arith.constant 0 : index
    %c0_2 = arith.constant 0 : index
    %2 = vector.load %arg2[%c0_1, %c0_2] : memref<32x128xbf16, #tpu.memory_space<vmem>>, vector<32x128xbf16>
    %cst = arith.constant dense<0.000000e+00> : vector<8x128xf32>
    %3 = tpu.matmul %1, %2, %cst {dimension_numbers = #tpu.dot_dimension_numbers<[1], [0], [0], [1], [0, 0, 1, 1], [], []>} : vector<8x32xbf16>, vector<32x128xbf16>, vector<8x128xf32> -> vector<8x128xf32>
    %c0_3 = arith.constant 0 : index
    %c0_4 = arith.constant 0 : index
    %4 = vector.load %arg3[%c0_3, %c0_4] : memref<1x128xf32, #tpu.memory_space<vmem>>, vector<1x128xf32>
    %5 = vector.broadcast %4 : vector<1x128xf32> to vector<8x128xf32>
    %6 = arith.addf %3, %5 : vector<8x128xf32>
    %cst_5 = arith.constant 0.000000e+00 : f32
    %7 = vector.broadcast %cst_5 : f32 to vector<8x128xf32>
    %8 = arith.maximumf %6, %7 : vector<8x128xf32>
    %9 = arith.truncf %8 : vector<8x128xf32> to vector<8x128xbf16>
    %c0_6 = arith.constant 0 : index
    %c0_7 = arith.constant 0 : index
    %10 = vector.load %arg4[%c0_6, %c0_7] : memref<128x16xbf16, #tpu.memory_space<vmem>>, vector<128x16xbf16>
    %cst_8 = arith.constant dense<0.000000e+00> : vector<8x16xf32>
    %11 = tpu.matmul %9, %10, %cst_8 {dimension_numbers = #tpu.dot_dimension_numbers<[1], [0], [0], [1], [0, 0, 1, 1], [], []>} : vector<8x128xbf16>, vector<128x16xbf16>, vector<8x16xf32> -> vector<8x16xf32>
    %c0_9 = arith.constant 0 : index
    %c0_10 = arith.constant 0 : index
    %12 = vector.load %arg5[%c0_9, %c0_10] : memref<1x16xf32, #tpu.memory_space<vmem>>, vector<1x16xf32>
    %13 = vector.broadcast %12 : vector<1x16xf32> to vector<8x16xf32>
    %14 = arith.addf %11, %13 : vector<8x16xf32>
    %c0_11 = arith.constant 0 : index
    %c0_12 = arith.constant 0 : index
    %15 = vector.load %arg6[%c0_11, %c0_12] : memref<8x16xf32, #tpu.memory_space<vmem>>, vector<8x16xf32>
    tpu.vector_store %arg6[%c0_11, %c0_12], %14 {strides = array<i32>} : memref<8x16xf32, #tpu.memory_space<vmem>>, vector<8x16xf32>,
    return
  }
  func.func @transform_0(%arg0: i32) -> (i32, i32) {
    %c0_i32 = arith.constant 0 : i32
    %c0_i32_0 = arith.constant 0 : i32
    return %arg0, %c0_i32 : i32, i32
  }
  func.func @transform_1(%arg0: i32) -> (i32, i32) {
    %c0_i32 = arith.constant 0 : i32
    %c0_i32_0 = arith.constant 0 : i32
    %c0_i32_1 = arith.constant 0 : i32
    return %c0_i32, %c0_i32_0 : i32, i32
  }
  func.func @transform_2(%arg0: i32) -> (i32, i32) {
    %c0_i32 = arith.constant 0 : i32
    %c0_i32_0 = arith.constant 0 : i32
    %c0_i32_1 = arith.constant 0 : i32
    return %c0_i32, %c0_i32_0 : i32, i32
  }
  func.func @transform_3(%arg0: i32) -> (i32, i32) {
    %c0_i32 = arith.constant 0 : i32
    %c0_i32_0 = arith.constant 0 : i32
    %c0_i32_1 = arith.constant 0 : i32
    return %c0_i32, %c0_i32_0 : i32, i32
  }
  func.func @transform_4(%arg0: i32) -> (i32, i32) {
    %c0_i32 = arith.constant 0 : i32
    %c0_i32_0 = arith.constant 0 : i32
    %c0_i32_1 = arith.constant 0 : i32
    return %c0_i32, %c0_i32_0 : i32, i32
  }
  func.func @transform_5(%arg0: i32) -> (i32, i32) {
    %c0_i32 = arith.constant 0 : i32
    %c0_i32_0 = arith.constant 0 : i32
    return %arg0, %c0_i32 : i32, i32
  }
}

</mosaic_0001>

<bundles_post_ra>
// kernel: fcnn_forward.1
= control target key start
LH: loop header
LB: loop body
LE: loop exit
PB: predicated region body
PF: predicated region fallthrough
CT: control target
= control target key end

     0   :  { %v310_v1 = vmov 0.0   ;;  %vm311_vm0 = vmmov 0   ;;  %vm47_vm1 = vcmask 261120   ;;  %s394_s0 = inlined_call_operand.vmem [shape: f32[8,32], index: 0, kind: input, shape index: {}]   ;;  %s395_s1 = inlined_call_operand.vmem [shape: bf16[32,128], index: 1, kind: input, shape index: {}]   ;;  %s396_s2 = inlined_call_operand.vmem [shape: f32[1,128], index: 2, kind: input, shape index: {}]   ;;  %s397_s3 = inlined_call_operand.vmem [shape: bf16[128,16], index: 3, kind: input, shape index: {}]   ;;  %s398_s4 = inlined_call_operand.vmem [shape: f32[1,16], index: 4, kind: input, shape index: {}]   ;;  %s399_s5 = inlined_call_operand.hbm [shape: f32[8,16], index: 5, kind: output, shape index: {}]  }
   0x1   :  { %v276_v0 = vld [vmem:[%s395_s1] sm:$0xff]   ;;  %245 = vmatprep.subr.bf16.mxu0 %v310_v1  ;;  %v277_v2 = vld [vmem:[%s395_s1 + $0x8] sm:$0xff]   ;;  %253 = vmatprep.subr.bf16.mxu1 %v310_v1  ;;  %v280_v7 = vld [vmem:[%s397_s3 + $0x10] sm:$0xff]  }
   0x2   :  { %246 = vmatpush3.bf16.msra.mxu0 %v276_v0  ;;  %249 = vmatprep.mubr.msk.bf16.mxu0 %vm311_vm0, %v310_v1  ;;  %v22_v3 = vld [vmem:[%s394_s0] sm:$0xff]  ;;  %v279_v6 = vld [vmem:[%s397_s3 + $0x8] sm:$0xff]  }
   0x3   :  { %247 = vmatprep.subr.bf16.mxu0 %v310_v1  ;;  %v278_v4 = vld [vmem:[%s397_s3] sm:$0xff]   ;;  %269 = vmatprep.mubr.msk.bf16.mxu1 %vm311_vm0, %v310_v1  ;;  %v23_v5 = vpack.c.bf16 %v22_v3, %v22_v3 }
   0x4   :  { %254 = vmatpush3.bf16.msra.mxu1 %v278_v4 }
   0x5   :  { %255 = vmatprep.subr.bf16.mxu1 %v310_v1 }
   0x6   :  { %248 = vmatpush3.bf16.msra.mxu0 %v277_v2 }
   0x8   :  { %256 = vmatpush3.bf16.msra.mxu1 %v279_v6 }
   0x9   :  { %250 = vmatmul.mubr.msk.bf16.vlgmr.msra.gmra.mrb[0].mxu0 %vm47_vm1, %v23_v5  ;;  %257 = vmatprep.subr.bf16.mxu1 %v310_v1 }
   0xa   :  { %10 = vsyncpa [#allocation3], 0  ;;  %v281_v8 = vld [vmem:[%s397_s3 + $0x18] sm:$0xff]   ;;  %v282_v9 = vld [vmem:[%s397_s3 + $0x20] sm:$0xff]   ;;  %s312_s17 = smov [#allocation2]   ;;  %vm204_vm2 = vcmask 130048  }
   0xb   :  { %v283_v10 = vld [vmem:[%s397_s3 + $0x28] sm:$0xff]   ;;  %v284_v11 = vld [vmem:[%s397_s3 + $0x30] sm:$0xff]   ;;  %v285_v12 = vld [vmem:[%s397_s3 + $0x38] sm:$0xff]   ;;  %s212_s18 = sshll.u32 %s312_s17, 4  ;;  %s213_s18 = int_to_ptr.vmem [resolvable:$true] %s212_s18 }
   0xc   :  { %258 = vmatpush3.bf16.msra.mxu1 %v280_v7  ;;  %v220_v13 = vld [vmem:[%s396_s2] ss:$0 sm:$0xff]  ;;  %s286_s2 = scalar_lea.vmem %s213_s18, 128  ;;  %p291_p1 = scmp.lt.s32.totalorder %s213_s18, %s213_s18 }
   0xd   :  { %259 = vmatprep.subr.bf16.mxu1 %v310_v1  ;;  %v224_v21 = vld [vmem:[%s398_s4] ss:$0 sm:$0xff]  ;;  %p287_p0 = scmp.ne.s32.totalorder %s213_s18, %s286_s2  ;;  %p292_p2 = scmp.lt.s32.totalorder %s286_s2, %s286_s2 }
   0xf   :  { %p293_p3 = por %p292_p2, %p291_p1 }
  0x10   :  { %260 = vmatpush3.bf16.msra.mxu1 %v281_v8 }
  0x11   :  { %261 = vmatprep.subr.bf16.mxu1 %v310_v1  ;;  %p294_p4 = pnand %p293_p3, %p287_p0 }
  0x14   :  { %262 = vmatpush3.bf16.msra.mxu1 %v282_v9 }
  0x15   :  { %263 = vmatprep.subr.bf16.mxu1 %v310_v1 }
  0x18   :  { %264 = vmatpush3.bf16.msra.mxu1 %v283_v10 }
  0x19   :  { %265 = vmatprep.subr.bf16.mxu1 %v310_v1 }
  0x1c   :  { %266 = vmatpush3.bf16.msra.mxu1 %v284_v11 }
  0x1d   :  { %267 = vmatprep.subr.bf16.mxu1 %v310_v1 }
  0x20   :  { %268 = vmatpush3.bf16.msra.mxu1 %v285_v12 }
  0xdc   :  { %v85_v14 = vpop.f32.mrb[0].mxu0 }
  0xdd   :  { %v86_v15 = vadd.f32 %v220_v13, %v85_v14  ;;  %v251_v16 = vpop.f32.mrb[1].mxu0 }
  0xde   :  { %v88_v17 = vpop.f32.mrb[2].mxu0 }
  0xdf   :  { %v91_v18 = vmax.f32 %v86_v15, 0.0  ;;  %v252_v19 = vpop.f32.mrb[3].mxu0 }
  0xe1   :  { %v92_v20 = vpack.c.bf16 %v91_v18, %v91_v18 }
  0xe3   :  { %270 = vmatmul.mubr.bf16.vlgmr.msra.gmra.mrb[0].mxu1 %v92_v20 }
 0x1b6   :  { %v198_v22 = vpop.f32.mrb[0].mxu1 }
 0x1b7   :  { %v199_v23 = vadd.f32 %v224_v21, %v198_v22  ;;  %v271_v24 = vpop.f32.mrb[1].mxu1 }
 0x1b8   :  { %v201_v25 = vpop.f32.mrb[2].mxu1 }
 0x1b9   :  { %v272_v26 = vpop.f32.mrb[3].mxu1  ;;  %205 = vst.msk [vmem:[#allocation2] sm:$0xff] %vm204_vm2, %v199_v23 }
 0x1ba   :  { %297 = shalt.err (!%p294_p4)
}
 0x1bb   :  { %s298_s4 = scalar_lea.hbm %s399_s5, 128 }
 0x1bc   :  { %p299_p5 = scmp.ne.s32.totalorder %s399_s5, %s298_s4  ;;  %p302_p6 = scmp.lt.u32.totalorder %s298_s4, %s399_s5 }
 0x1be   :  { %p304_p7 = pnand %p302_p6, %p299_p5 }
 0x1c0   :  { %307 = shalt.err (!%p304_p7)
}
 0x1c1   :  { %215 = dma.vmem_to_hbm [thread:$0]  %s213_s18, 128, %s399_s5, [#allocation3]  }
 0x1c2   :  { %308 = dma.done.wait [#allocation3], 128  }
 0x1c3   :  { %309 = vsyncadd [#allocation3], 4294967168 }
 0x1c4   :  { %219 = vsyncpa [#allocation3], 1 }

</bundles_post_ra>
